<compile_context>
chip_gen: v7x
topology: tpu7x:2x2x1
jax: 0.10.0
libtpu: 0.0.40
codegen_flags: <defaults>
</compile_context>

<pallas_src>
import jax
import jax.numpy as jnp
from jax.experimental import pallas as pl
from jax.experimental.pallas import tpu as pltpu


def _make_gem_kernel(*, p: float, eps: float):
    inv_p = 1.0 / float(p)

    def kernel(x_ref, o_ref):
        # x_ref: (1, S, tc) -- full spatial extent in one block, channels on lanes.
        x = x_ref[...].astype(jnp.float32)
        xc = jnp.maximum(x, jnp.float32(eps))               # clamp(min=eps)
        if float(p) == 3.0:
            xp = xc * xc * xc                               # p=3 stays on the VPU
        else:
            xp = jnp.exp(jnp.log(xc) * jnp.float32(p))      # general p via EUP
        mean = jnp.mean(xp, axis=1, keepdims=True)          # (1, 1, tc), XLU reduce
        # mean >= eps**p > 0, so exp(log(.)/p) is safe and only touches (1, 1, tc).
        o_ref[...] = jnp.exp(jnp.log(mean) * jnp.float32(inv_p)).astype(o_ref.dtype)

    return kernel


def _pick_channel_tile(B: int, C: int, S: int) -> int:
    # Full-channel block by default: a block dim equal to the full array dim is exempt
    # from the 128-divisibility rule, so no channel padding / masked stores are needed.
    tc = C
    # v7x has 2 TensorCores: guarantee >= 2 parallel grid steps when B == 1.
    if B == 1 and C % 256 == 0:
        tc = C // 2
    # Keep the double-buffered input tile well under the scoped VMEM limit (only matters
    # for absurdly large feature maps; ResNet-scale maps are ~100 KB).
    while 2 * S * tc * 4 > (16 << 20) and tc % 256 == 0:
        tc //= 2
    return tc


def gem_embed(features: jax.Array, p: float = 3.0, eps: float = 1e-6,
              channels_last: bool = True) -> jax.Array:
    """Net.forward tail: GeM pooling of a backbone feature map -> (B, C) embedding.

    Preferred layout is channels-last (B, H, W, C), the TPU-native conv output layout,
    so no HBM transpose is needed before the kernel.
    """
    if not channels_last:
        # NCHW fallback; costs one HBM round trip — prefer emitting channels-last.
        features = jnp.transpose(features, (0, 2, 3, 1))
    B, H, W, C = features.shape
    S = H * W

    # (B, H, W, C) -> (B, S, C) is a free reshape (no data movement).
    x = features.reshape(B, S, C)

    tc = _pick_channel_tile(B, C, S)
    grid = (B, C // tc)

    out = pl.pallas_call(
        _make_gem_kernel(p=float(p), eps=float(eps)),
        out_shape=jax.ShapeDtypeStruct((B, 1, C), jnp.float32),
        grid_spec=pltpu.PrefetchScalarGridSpec(
            num_scalar_prefetch=0,
            grid=grid,
            in_specs=[pl.BlockSpec((1, S, tc), lambda b, c: (b, 0, c))],
            out_specs=pl.BlockSpec((1, 1, tc), lambda b, c: (b, 0, c)),
        ),
        compiler_params=pltpu.CompilerParams(
            dimension_semantics=("parallel", "parallel"),
        ),
    )(x)

    return out.reshape(B, C)


if __name__ == "__main__":
    # resnet18 forward_features on a 224x224 image -> 512-channel 7x7 feature map,
    # emitted channels-last (the TPU-native layout) so the kernel reads it in place.
    B, C, H, W = 2, 512, 7, 7
    key = jax.random.PRNGKey(0)
    features_nhwc = jax.nn.relu(jax.random.normal(key, (B, H, W, C), dtype=jnp.float32))

    embed = gem_embed(features_nhwc)
    embed = jax.block_until_ready(embed)

    # Pure-JAX reference mirroring gem() + x[:, :, 0, 0] from the PyTorch module (NCHW).
    def _ref(x_nchw, p=3.0, eps=1e-6):
        pooled = jnp.mean(jnp.maximum(x_nchw, eps) ** p, axis=(2, 3))  # avg_pool2d over (H, W)
        return pooled ** (1.0 / p)

    ref = _ref(jnp.transpose(features_nhwc, (0, 3, 1, 2)))
    assert embed.shape == (B, C)
    assert jnp.allclose(embed, ref, atol=1e-5, rtol=1e-5), "mismatch vs reference"
    print("KERNEL_OK")
</pallas_src>

<mosaic_0001>
module attributes {stable_mosaic.version = 11 : i64} {
  func.func @kernel(%arg0: i32, %arg1: i32, %arg2: memref<1x49x512xf32, #tpu.memory_space<vmem>>, %arg3: memref<1x1x512xf32, #tpu.memory_space<vmem>>) attributes {dimension_semantics = [#tpu.dimension_semantics<parallel>, #tpu.dimension_semantics<parallel>], iteration_bounds = array<i64: 2, 1>, scalar_prefetch = 0 : i64, scratch_operands = 0 : i64, tpu.core_type = #tpu.core_type<tc>, window_params = [{transform_indices = @transform_0, window_bounds = array<i64: 1, 49, 512>}, {transform_indices = @transform_1, window_bounds = array<i64: 1, 1, 512>}]} {
    %c0 = arith.constant 0 : index
    %c0_0 = arith.constant 0 : index
    %c0_1 = arith.constant 0 : index
    %0 = vector.load %arg2[%c0, %c0_0, %c0_1] : memref<1x49x512xf32, #tpu.memory_space<vmem>>, vector<1x49x512xf32>
    %cst = arith.constant 9.99999997E-7 : f32
    %1 = vector.broadcast %cst : f32 to vector<1x49x512xf32>
    %2 = arith.maximumf %0, %1 : vector<1x49x512xf32>
    %3 = arith.mulf %2, %2 : vector<1x49x512xf32>
    %4 = arith.mulf %3, %2 : vector<1x49x512xf32>
    %cst_2 = arith.constant dense<0.000000e+00> : vector<1x512xf32>
    %5 = vector.multi_reduction <add>, %4, %cst_2 [1] : vector<1x49x512xf32> to vector<1x512xf32>
    %6 = vector.shape_cast %5 : vector<1x512xf32> to vector<1x1x512xf32>
    %cst_3 = arith.constant 4.900000e+01 : f32
    %7 = vector.broadcast %cst_3 : f32 to vector<1x1x512xf32>
    %8 = arith.divf %6, %7 : vector<1x1x512xf32>
    %9 = math.log %8 : vector<1x1x512xf32>
    %cst_4 = arith.constant 0.333333343 : f32
    %10 = vector.broadcast %cst_4 : f32 to vector<1x1x512xf32>
    %11 = arith.mulf %9, %10 : vector<1x1x512xf32>
    %12 = math.exp %11 : vector<1x1x512xf32>
    %c0_5 = arith.constant 0 : index
    %c0_6 = arith.constant 0 : index
    %c0_7 = arith.constant 0 : index
    %13 = vector.load %arg3[%c0_5, %c0_6, %c0_7] : memref<1x1x512xf32, #tpu.memory_space<vmem>>, vector<1x1x512xf32>
    tpu.vector_store %arg3[%c0_5, %c0_6, %c0_7], %12 {strides = array<i32>} : memref<1x1x512xf32, #tpu.memory_space<vmem>>, vector<1x1x512xf32>,
    return
  }
  func.func @transform_0(%arg0: i32, %arg1: i32) -> (i32, i32, i32) {
    %c0_i32 = arith.constant 0 : i32
    %c0_i32_0 = arith.constant 0 : i32
    return %arg0, %c0_i32, %arg1 : i32, i32, i32
  }
  func.func @transform_1(%arg0: i32, %arg1: i32) -> (i32, i32, i32) {
    %c0_i32 = arith.constant 0 : i32
    %c0_i32_0 = arith.constant 0 : i32
    return %arg0, %c0_i32, %arg1 : i32, i32, i32
  }
}

</mosaic_0001>

<bundles_post_ra>
// kernel: tpu_custom_call.1
= control target key start
LH: loop header
LB: loop body
LE: loop exit
PB: predicated region body
PF: predicated region fallthrough
CT: control target
= control target key end

     0   :  { %6 = vsyncpa [#allocation3], 0  ;;  %s804_s0 = inlined_call_operand.vmem [shape: f32[2,49,512], index: 0, kind: input, shape index: {}]   ;;  %s805_s1 = inlined_call_operand.hbm [shape: f32[2,1,512], index: 1, kind: output, shape index: {}]  }
   0x1   :  { %8 = vsyncpa [#allocation3 + $0x1], 0  ;;  %s641_s6 = smov 0   ;;  %s643_s7 = smov 0  }
   0x2   :  { %s645_s8 = smov 0   ;;  %s647_s9 = smov 0  }
   0x3   :  { %s649_s10 = smov 0   ;;  %s651_s11 = smov 0  }
   0x4 LB: > { %s463_s12 = sadd.s32 4294967295, %s627_s11   ;;  %s464_s13 = sadd.s32 4294967294, %s627_s11   ;;  %s627_s11 = sphi %s651_s11, %s14_s11   ;;  %s623_s10 = sphi %s649_s10, %s816_s10   ;;  %s619_s9 = sphi %s647_s9, %s815_s9   ;;  %s615_s8 = sphi %s645_s8, %s814_s8   ;;  %s611_s7 = sphi %s643_s7, %s813_s7   ;;  %s607_s6 = sphi %s641_s6, %s812_s6  }
   0x5   : > { %s26_s14 = sadd.s32 1, %s623_s10  ;;  %s63_s15 = sadd.s32 1, %s615_s8 }
   0x6   : > { %p28_p0 = scmp.ge.s32.totalorder %s26_s14, 2  ;;  %p73_p1 = scmp.ne.s32.totalorder %s615_s8, %s611_s7 }
   0x7   : > { %p74_p2 = scmp.eq.s32.totalorder %s463_s12, 1  ;;  %p79_p3 = scmp.ne.s32.totalorder %s611_s7, %s607_s6 }
   0x8   : > { %s818_s14 = smov (%p28_p0, %s26_s14), 0  ;;  %p80_p5 = scmp.eq.s32.totalorder %s464_s13, 1 }
   0x9   : > { %p681_p4 = por %p74_p2, %p73_p1  ;;  %s58_s17 = ssub.s32 %s623_s10, %s818_s14 }
   0xa   : > { %p467_p6 = scmp.ge.s32.totalorder %s627_s11, 1  ;;  %p61_p7 = scmp.eq.s32.totalorder %s58_s17, 0 }
   0xb   : > { %p688_p8 = por %p80_p5, %p79_p3  ;;  %p111_p9 = scmp.lt.s32.totalorder %s627_s11, 3 }
   0xc   : > { %s694_s19 = scalar_select %p61_p7, %s615_s8, %s63_s15  }
   0xd   : > { %p112_p10 = pnand %p467_p6, %p111_p9 }
   0xf   : > { %115 = sbr.rel (%p112_p10) target bundleno = 130 (0x82), region = 24 }
  0x16   : > { %p136_p11 = scmp.lt.s32.totalorder %s619_s9, 1  ;;  %vm263_vm0 = vcmask 1040384   ;;  %s132_s25 = sand.u32 1, %s611_s7  }
  0x17   : > { %s468_s26 = sshll.u32 %s132_s25, 2  ;;  %s475_s27 = sshll.u32 %s619_s9, 6 }
  0x18   : > { %s137_s20 = scalar_select %p136_p11, %s619_s9, 1 }
  0x19   : > { %s134_s28 = scalar_lea.vmem [#allocation2], %s468_s26  ;;  %s757_s3 = scalar_lea.hbm %s805_s1, %s475_s27 }
  0x1a   : > { %s476_s21 = smul.u32 224, %s137_s20  ;;  %s387_s29 = sshll.u32 %s134_s28, 4  ;;  %s759_s29 = int_to_ptr.vmem [resolvable:$true] %s387_s29 }
  0x1b   : > { %s371_s4 = scalar_lea.sflag [#allocation3], %s132_s25  ;;  %s549_s5 = scalar_lea.vmem %s759_s29, 64 }
  0x1c   : > { %s701_s24 = scalar_lea.vmem %s804_s0, %s476_s21  ;;  %p550_p12 = scmp.ne.s32.totalorder %s759_s29, %s549_s5 }
  0x1d   : > { %v146_v0 = vld [vmem:[%s701_s24] sm:$0xff]  ;;  %v147_v1 = vld [vmem:[%s701_s24 + $0x8] sm:$0xff]  ;;  %v148_v2 = vld [vmem:[%s701_s24 + $0x10] sm:$0xff]  ;;  %s630_s9 = smov [#allocation2]  }
  0x1e   : > { %v149_v3 = vld [vmem:[%s701_s24 + $0x18] sm:$0xff]  ;;  %v150_v4 = vld [vmem:[%s701_s24 + $0x20] sm:$0xff]  ;;  %v174_v5 = vmax.f32 %v146_v0, 1e-06  ;;  %v175_v6 = vmax.f32 %v147_v1, 1e-06  ;;  %p551_p13 = pnand %p550_p12, %p681_p4 }
  0x1f   : > { %v151_v7 = vld [vmem:[%s701_s24 + $0x28] sm:$0xff]  ;;  %v176_v8 = vmax.f32 %v148_v2, 1e-06  ;;  %v152_v9 = vld [vmem:[%s701_s24 + $0x30] sm:$0xff]  ;;  %v177_v10 = vmax.f32 %v149_v3, 1e-06 }
  0x20   : > { %v178_v11 = vmax.f32 %v150_v4, 1e-06  ;;  %v153_v12 = vld [vmem:[%s701_s24 + $0x38] sm:$0xff]  ;;  %v154_v13 = vld [vmem:[%s701_s24 + $0x40] sm:$0xff]  ;;  %v179_v14 = vmax.f32 %v151_v7, 1e-06  ;;  %v202_v15 = vmul.f32 %v174_v5, %v174_v5  ;;  %v203_v16 = vmul.f32 %v175_v6, %v175_v6  ;;  %p552_p0 = pneg %p551_p13 }
  0x21   : > { %v155_v17 = vld [vmem:[%s701_s24 + $0x48] sm:$0xff]  ;;  %v156_v18 = vld [vmem:[%s701_s24 + $0x50] sm:$0xff]  ;;  %v157_v19 = vld [vmem:[%s701_s24 + $0x58] sm:$0xff]  ;;  %v715_v20 = vmax.f32 %v152_v9, 1e-06  ;;  %v204_v21 = vmul.f32 %v176_v8, %v176_v8  ;;  %v205_v22 = vmul.f32 %v177_v10, %v177_v10  ;;  %s553_s12 = sshll.u32 %s630_s9, 4  ;;  %s554_s12 = int_to_ptr.vmem [resolvable:$false] %s553_s12 }
  0x22   : > { %v158_v23 = vld [vmem:[%s701_s24 + $0x60] sm:$0xff]  ;;  %v159_v24 = vld [vmem:[%s701_s24 + $0x68] sm:$0xff]  ;;  %v160_v25 = vld [vmem:[%s701_s24 + $0x70] sm:$0xff]  ;;  %v206_v26 = vmul.f32 %v178_v11, %v178_v11  ;;  %v207_v30 = vmul.f32 %v179_v14, %v179_v14  ;;  %v181_v34 = vmax.f32 %v153_v12, 1e-06  ;;  %v726_v35 = vmul.f32 %v202_v15, %v174_v5  ;;  %s555_s13 = scalar_lea.vmem %s554_s12, 128  ;;  %p556_p1 = scmp.lt.s32.totalorder %s759_s29, %s554_s12 }
  0x23   : > { %v161_v27 = vld [vmem:[%s701_s24 + $0x78] sm:$0xff]  ;;  %v162_v28 = vld [vmem:[%s701_s24 + $0x80] sm:$0xff]  ;;  %v163_v29 = vld [vmem:[%s701_s24 + $0x88] sm:$0xff]  ;;  %v728_v36 = vmul.f32 %v203_v16, %v175_v6  ;;  %v182_v40 = vmax.f32 %v154_v13, 1e-06  ;;  %v208_v41 = vmul.f32 %v715_v20, %v715_v20  ;;  %v735_v42 = vmul.f32 %v204_v21, %v176_v8  ;;  %p557_p2 = scmp.lt.s32.totalorder %s555_s13, %s549_s5 }
  0x24   : > { %v164_v31 = vld [vmem:[%s701_s24 + $0x90] sm:$0xff]  ;;  %v165_v32 = vld [vmem:[%s701_s24 + $0x98] sm:$0xff]  ;;  %v166_v33 = vld [vmem:[%s701_s24 + $0xa0] sm:$0xff]  ;;  %v737_v43 = vmul.f32 %v205_v22, %v177_v10  ;;  %v183_v47 = vmax.f32 %v155_v17, 1e-06  ;;  %v234_v50 = vmul.f32 %v206_v26, %v178_v11  ;;  %v235_v55 = vmul.f32 %v207_v30, %v179_v14 }
  0x25   : > { %v167_v37 = vld [vmem:[%s701_s24 + $0xa8] sm:$0xff]  ;;  %v168_v38 = vld [vmem:[%s701_s24 + $0xb0] sm:$0xff]  ;;  %v169_v39 = vld [vmem:[%s701_s24 + $0xb8] sm:$0xff]  ;;  %808 = vst [vmem:[#allocation5_spill] sm:$0xff] %v735_v42  ;;  %v184_v48 = vmax.f32 %v156_v18, 1e-06  ;;  %v209_v59 = vmul.f32 %v181_v34, %v181_v34  ;;  %v210_v63 = vmul.f32 %v182_v40, %v182_v40  ;;  %p558_p3 = por %p557_p2, %p556_p1 }
  0x26   : > { %809 = vst [vmem:[#allocation6_spill] sm:$0xff] %v737_v43  ;;  %v170_v44 = vld [vmem:[%s701_s24 + $0xc0] sm:$0x1]  ;;  %v171_v45 = vld [vmem:[%s701_s24 + $0xc8] sm:$0x1]  ;;  %v211_v3 = vmul.f32 %v183_v47, %v183_v47  ;;  %v272_v42 = vadd.f32 %v235_v55, %v728_v36 }
  0x27   : > { %v172_v46 = vld [vmem:[%s701_s24 + $0xd0] sm:$0x1]  ;;  %v185_v49 = vmax.f32 %v157_v19, 1e-06  ;;  %v173_v51 = vld [vmem:[%s701_s24 + $0xd8] sm:$0x1]  ;;  %v212_v7 = vmul.f32 %v184_v48, %v184_v48  ;;  %p559_p5 = pnand %p558_p3, %p552_p0 }
  0x28   : > { %v186_v52 = vmax.f32 %v158_v23, 1e-06  ;;  %v187_v53 = vmax.f32 %v159_v24, 1e-06  ;;  %v188_v54 = vmax.f32 %v160_v25, 1e-06  ;;  %v239_v30 = vmul.f32 %v211_v3, %v183_v47 }
  0x29   : > { %v189_v56 = vmax.f32 %v161_v27, 1e-06  ;;  %v190_v57 = vmax.f32 %v162_v28, 1e-06  ;;  %v191_v58 = vmax.f32 %v163_v29, 1e-06  ;;  %v213_v9 = vmul.f32 %v185_v49, %v185_v49 }
  0x2a   : > { %v192_v60 = vmax.f32 %v164_v31, 1e-06  ;;  %v193_v61 = vmax.f32 %v165_v32, 1e-06  ;;  %v194_v62 = vmax.f32 %v166_v33, 1e-06  ;;  %v214_v10 = vmul.f32 %v186_v52, %v186_v52 }
  0x2b   : > { %v195_v0 = vmax.f32 %v167_v37, 1e-06  ;;  %v196_v1 = vmax.f32 %v168_v38, 1e-06  ;;  %v197_v2 = vmax.f32 %v169_v39, 1e-06  ;;  %v215_v11 = vmul.f32 %v187_v53, %v187_v53 }
  0x2c   : > { %v198_v4 = vmax.f32 %v170_v44, 1e-06  ;;  %v199_v5 = vmax.f32 %v171_v45, 1e-06  ;;  %v200_v6 = vmax.f32 %v172_v46, 1e-06  ;;  %v216_v12 = vmul.f32 %v188_v54, %v188_v54 }
  0x2d   : > { %v201_v8 = vmax.f32 %v173_v51, 1e-06  ;;  %v217_v13 = vmul.f32 %v189_v56, %v189_v56  ;;  %v218_v14 = vmul.f32 %v190_v57, %v190_v57  ;;  %v219_v15 = vmul.f32 %v191_v58, %v191_v58 }
  0x2e   : > { %v220_v16 = vmul.f32 %v192_v60, %v192_v60  ;;  %v221_v17 = vmul.f32 %v193_v61, %v193_v61  ;;  %v222_v18 = vmul.f32 %v194_v62, %v194_v62  ;;  %v223_v19 = vmul.f32 %v195_v0, %v195_v0 }
  0x2f   : > { %v224_v21 = vmul.f32 %v196_v1, %v196_v1  ;;  %v225_v22 = vmul.f32 %v197_v2, %v197_v2  ;;  %v226_v23 = vmul.f32 %v198_v4, %v198_v4  ;;  %v227_v24 = vmul.f32 %v199_v5, %v199_v5 }
  0x30   : > { %v228_v25 = vmul.f32 %v200_v6, %v200_v6  ;;  %v229_v26 = vmul.f32 %v201_v8, %v201_v8  ;;  %v236_v27 = vmul.f32 %v208_v41, %v715_v20  ;;  %v237_v28 = vmul.f32 %v209_v59, %v181_v34  ;;  %v810_v20 = vld [vmem:[#allocation5_spill] sm:$0xff]  ;;  %v811_v34 = vld [vmem:[#allocation6_spill] sm:$0xff] }
  0x31   : > { %v238_v29 = vmul.f32 %v210_v63, %v182_v40  ;;  %v240_v31 = vmul.f32 %v212_v7, %v184_v48  ;;  %v241_v32 = vmul.f32 %v213_v9, %v185_v49  ;;  %v242_v33 = vmul.f32 %v214_v10, %v186_v52 }
  0x32   : > { %v243_v37 = vmul.f32 %v215_v11, %v187_v53  ;;  %v244_v38 = vmul.f32 %v216_v12, %v188_v54  ;;  %v245_v39 = vmul.f32 %v217_v13, %v189_v56  ;;  %v246_v44 = vmul.f32 %v218_v14, %v190_v57 }
  0x33   : > { %v247_v45 = vmul.f32 %v219_v15, %v191_v58  ;;  %v248_v46 = vmul.f32 %v220_v16, %v192_v60  ;;  %v258_v51 = vadd.f32 %v234_v50, %v726_v35  ;;  %v249_v43 = vmul.f32 %v221_v17, %v193_v61 }
  0x34   : > { %v285_v41 = vadd.f32 %v236_v27, %v810_v20  ;;  %v298_v59 = vadd.f32 %v237_v28, %v811_v34  ;;  %v250_v40 = vmul.f32 %v222_v18, %v194_v62  ;;  %v251_v47 = vmul.f32 %v223_v19, %v195_v0 }
  0x35   : > { %v252_v48 = vmul.f32 %v224_v21, %v196_v1  ;;  %v259_v49 = vadd.f32 %v258_v51, %v238_v29  ;;  %v254_v52 = vmul.f32 %v226_v23, %v198_v4  ;;  %v273_v53 = vadd.f32 %v272_v42, %v239_v30 }
  0x36   : > { %v286_v54 = vadd.f32 %v285_v41, %v240_v31  ;;  %v299_v56 = vadd.f32 %v298_v59, %v241_v32  ;;  %v255_v57 = vmul.f32 %v227_v24, %v199_v5  ;;  %v256_v58 = vmul.f32 %v228_v25, %v200_v6 }
  0x37   : > { %v257_v60 = vmul.f32 %v229_v26, %v201_v8  ;;  %v260_v63 = vadd.f32 %v259_v49, %v242_v33  ;;  %v253_v35 = vmul.f32 %v225_v22, %v197_v2  ;;  %v274_v50 = vadd.f32 %v273_v53, %v243_v37 }
  0x38   : > { %v287_v61 = vadd.f32 %v286_v54, %v244_v38  ;;  %v300_v36 = vadd.f32 %v299_v56, %v245_v39  ;;  %v264_v3 = vsel %vm263_vm0, %v254_v52, 0.0  ;;  %v277_v4 = vsel %vm263_vm0, %v255_v57, 0.0 }
  0x39   : > { %v261_v55 = vadd.f32 %v260_v63, %v246_v44  ;;  %v275_v7 = vadd.f32 %v274_v50, %v247_v45  ;;  %v290_v42 = vsel %vm263_vm0, %v256_v58, 0.0  ;;  %v303_v5 = vsel %vm263_vm0, %v257_v60, 0.0 }
  0x3a   : > { %v288_v62 = vadd.f32 %v287_v61, %v248_v46  ;;  %v301_v0 = vadd.f32 %v300_v36, %v249_v43  ;;  %v345_v61 = vlaneseq }
  0x3b   : > { %v262_v1 = vadd.f32 %v261_v55, %v250_v40  ;;  %v276_v6 = vadd.f32 %v275_v7, %v251_v47 }
  0x3c   : > { %v289_v8 = vadd.f32 %v288_v62, %v252_v48  ;;  %v302_v9 = vadd.f32 %v301_v0, %v253_v35  ;;  %v629_v35 = vmov 1966171168   ;;  %v346_v55 = vshrl.u32 %v345_v61, 7 }
  0x3d   : > { %v265_v2 = vadd.f32 %v264_v3, %v262_v1  ;;  %v278_v10 = vadd.f32 %v277_v4, %v276_v6  ;;  %v343_v50 = vunpack.c.l.s4 %v629_v35  ;;  %vm367_vm1 = vcmp.lt.s32.totalorder %v345_v61, 512 }
  0x3e   : > { %v291_v11 = vadd.f32 %v290_v42, %v289_v8  ;;  %v304_v12 = vadd.f32 %v303_v5, %v302_v9 }
  0x3f   : > { %v266_v13 = vrot.slane %v265_v2, 4  ;;  %v279_v14 = vrot.slane %v278_v10, 4  ;;  %v344_v36 = vunpack.c.0.s8 %v343_v50 }
  0x40   : > { %v292_v15 = vrot.slane %v291_v11, 4  ;;  %v305_v16 = vrot.slane %v304_v12, 4 }
  0x41   : > { %v267_v17 = vadd.f32 %v266_v13, %v265_v2  ;;  %v280_v43 = vadd.f32 %v279_v14, %v278_v10  ;;  %v347_v7 = vsub.s32 %v344_v36, %v346_v55 }
  0x42   : > { %v293_v18 = vadd.f32 %v292_v15, %v291_v11  ;;  %v306_v19 = vadd.f32 %v305_v16, %v304_v12 }
  0x43   : > { %v268_v21 = vrot.slane %v267_v17, 2  ;;  %v281_v22 = vrot.slane %v280_v43, 2 }
  0x44   : > { %v294_v23 = vrot.slane %v293_v18, 2  ;;  %v307_v24 = vrot.slane %v306_v19, 2 }
  0x45   : > { %v269_v25 = vadd.f32 %v268_v21, %v267_v17  ;;  %v282_v26 = vadd.f32 %v281_v22, %v280_v43 }
  0x46   : > { %v295_v27 = vadd.f32 %v294_v23, %v293_v18  ;;  %v308_v28 = vadd.f32 %v307_v24, %v306_v19 }
  0x47   : > { %v270_v29 = vrot.slane %v269_v25, 1  ;;  %v283_v30 = vrot.slane %v282_v26, 1 }
  0x48   : > { %v296_v31 = vrot.slane %v295_v27, 1  ;;  %v309_v32 = vrot.slane %v308_v28, 1 }
  0x49   : > { %v271_v33 = vadd.f32 %v270_v29, %v269_v25  ;;  %v284_v37 = vadd.f32 %v283_v30, %v282_v26 }
  0x4a   : > { %v297_v38 = vadd.f32 %v296_v31, %v295_v27  ;;  %v310_v39 = vadd.f32 %v309_v32, %v308_v28 }
  0x4b   : > { %v312_v44 = vmul.f32 0.020408163, %v271_v33  ;;  %v313_v45 = vmul.f32 0.020408163, %v284_v37 }
  0x4c   : > { %v314_v46 = vmul.f32 0.020408163, %v297_v38  ;;  %v315_v51 = vmul.f32 0.020408163, %v310_v39 }
  0x4d   : > { %533 = vlog2.f32 %v312_v44 }
  0x4e   : > { %535 = vlog2.f32 %v313_v45 }
  0x4f   : > { %537 = vlog2.f32 %v314_v46 }
  0x50   : > { %539 = vlog2.f32 %v315_v51 }
  0x57   : > { %v534_v20 = vpop.eup %533 }
  0x58   : > { %v536_v41 = vpop.eup %535  ;;  %v317_v34 = vmul.f32 0.6931472, %v534_v20 }
  0x59   : > { %v538_v59 = vpop.eup %537  ;;  %v319_v40 = vmul.f32 0.6931472, %v536_v41 }
  0x5a   : > { %v540_v47 = vpop.eup %539  ;;  %v321_v48 = vmul.f32 0.6931472, %v538_v59  ;;  %v324_v49 = vmul.f32 0.33333334, %v317_v34 }
  0x5b   : > { %v323_v52 = vmul.f32 0.6931472, %v540_v47  ;;  %v325_v53 = vmul.f32 0.33333334, %v319_v40 }
  0x5c   : > { %v326_v54 = vmul.f32 0.33333334, %v321_v48  ;;  %v328_v56 = vmul.f32 1.442695, %v324_v49 }
  0x5d   : > { %v327_v57 = vmul.f32 0.33333334, %v323_v52  ;;  %v330_v58 = vmul.f32 1.442695, %v325_v53 }
  0x5e   : > { %541 = vpow2.f32 %v328_v56  ;;  %v332_v60 = vmul.f32 1.442695, %v326_v54 }
  0x5f   : > { %543 = vpow2.f32 %v330_v58  ;;  %v334_v63 = vmul.f32 1.442695, %v327_v57 }
  0x60   : > { %545 = vpow2.f32 %v332_v60 }
  0x61   : > { %547 = vpow2.f32 %v334_v63 }
  0x68   : > { %v542_v3 = vpop.eup %541 }
  0x69   : > { %v544_v62 = vpop.eup %543 }
  0x6a   : > { %v546_v0 = vpop.eup %545  ;;  %v340_v1 = vcombine.low %v542_v3, %v544_v62 }
  0x6b   : > { %v548_v4 = vpop.eup %547 }
  0x6c   : > { %v341_v42 = vcombine.low %v546_v0, %v548_v4  ;;  %v348_v5 = vrot.slane %v340_v1, %v347_v7 }
  0x6e   : > { %v355_v6 = vrot.slane %v341_v42, %v347_v7 }
  0x70   : > { %v356_v8 = vcombine.low %v348_v5, %v355_v6 }
  0x72   : > { %v363_v9 = vrot.slane %v356_v8, %v347_v7 }
  0x74   : > { %369 = vst.msk [vmem:[%s134_s28] sm:$0xf] %vm367_vm1, %v363_v9 }
  0x75   : > { %562 = shalt.err (!%p559_p5)
}
  0x76   : > { %s563_s15 = scalar_lea.hbm %s757_s3, 64  ;;  %s567_s21 = scalar_lea.hbm %s805_s1, 128 }
  0x77   : > { %p564_p6 = scmp.ne.s32.totalorder %s757_s3, %s563_s15  ;;  %p568_p10 = scmp.lt.u32.totalorder %s757_s3, %s805_s1 }
  0x78   : > { %p569_p11 = scmp.lt.u32.totalorder %s567_s21, %s563_s15  ;;  %p571_p13 = scmp.lt.u32.totalorder %s563_s15, %s757_s3 }
  0x79   : > { %p565_p7 = pnand %p564_p6, %p681_p4 }
  0x7a   : > { %p570_p12 = por %p569_p11, %p568_p10 }
  0x7b   : > { %p566_p9 = pneg %p565_p7 }
  0x7c   : > { %p572_p0 = por %p571_p13, %p570_p12 }
  0x7e   : > { %p573_p1 = pnand %p572_p0, %p566_p9 }
  0x80   : > { %576 = shalt.err (!%p573_p1)
}
  0x81   : > { %477 = dma.vmem_to_hbm [thread:$0]  (%p681_p4), %s759_s29, 64, %s757_s3, %s371_s4  }
  0x82 PF: > { %p483_p2 = scmp.ge.s32.totalorder %s627_s11, 2  ;;  %s399_s24 = sand.u32 1, %s607_s6  }
  0x83   : > { %s400_s25 = scalar_lea.sflag [#allocation3], %s399_s24 }
  0x84   : > { %p480_p3 = pnand %p483_p2, %p688_p8 }
  0x86   : > { %602 = dma.done.wait (!%p480_p3), %s400_s25, 64  }
  0x87   : > { %604 = vsyncadd (!%p480_p3), %s400_s25, 4294967232  ;;  %s14_s11 = sadd.s32 1, %s627_s11   ;;  %s812_s6 = smov %s611_s7 }
  0x88   : > { %p11_p5 = scmp.ge.s32.totalorder %s14_s11, 4   ;;  %s813_s7 = smov %s615_s8 }
  0x89   : > { %s814_s8 = smov %s694_s19  ;;  %s815_s9 = smov %s623_s10 }
  0x8a   : > { %s816_s10 = smov %s818_s14  ;;  %13 = sbr.rel (!%p11_p5) target bundleno = 4 (0x4), region = 59 }
  0x91   :  { %405 = vsyncpa [#allocation3], 1 }
  0x92   :  { %407 = vsyncpa [#allocation3 + $0x1], 1 }

</bundles_post_ra>
